<compile_context>
chip_gen: v7x
topology: tpu7x:2x2x1
jax: 0.10.0
libtpu: 0.0.40
codegen_flags: <defaults>
</compile_context>

<pallas_src>
import functools

import jax
import jax.numpy as jnp
from jax.experimental import pallas as pl
from jax.experimental.pallas import tpu as pltpu

_LANE = 128     # lane width (last dim)
_SUBLANE = 8    # sublane width (second-to-last dim)
_TM_MAX = 2048  # cap on batch-tile rows (tiles stay well under any VMEM limit)


def _round_up(n, m):
    return ((n + m - 1) // m) * m


def _pad2(a, rows, cols):
    pr, pc = rows - a.shape[0], cols - a.shape[1]
    if pr or pc:
        a = jnp.pad(a, ((0, pr), (0, pc)))
    return a


def _mlp_kernel(x_ref, w1_ref, b1_ref, w2_ref, b2_ref, w3_ref, b3_ref, o_ref):
    """Fused 3-layer MLP on one batch tile.

    Dots use bf16 operands + f32 accumulation; bias add / ReLU in f32;
    activations are re-cast to bf16 only as MXU inputs for the next layer.
    Zero-padded hidden lanes stay exactly zero through bias+ReLU, so the
    padded K rows of w3 contribute nothing (numerically exact padding).
    """
    x = x_ref[...].astype(jnp.bfloat16)                                   # [tm, S]
    h1 = jnp.dot(x, w1_ref[...], preferred_element_type=jnp.float32) + b1_ref[...]
    h1 = jnp.maximum(h1, 0.0).astype(jnp.bfloat16)                        # [tm, Hp]
    h2 = jnp.dot(h1, w2_ref[...], preferred_element_type=jnp.float32) + b2_ref[...]
    h2 = jnp.maximum(h2, 0.0).astype(jnp.bfloat16)                        # [tm, Hp]
    out = jnp.dot(h2, w3_ref[...], preferred_element_type=jnp.float32) + b3_ref[...]
    o_ref[...] = out.astype(o_ref.dtype)                                  # [tm, A]


def init_params(key, state_dim, hidden_dim, action_dim):
    """PyTorch-Linear-style init: U(-1/sqrt(fan_in), 1/sqrt(fan_in)).

    Weights stored as [in_dim, out_dim] (transposed vs. torch), biases [1, out].
    """
    ks = jax.random.split(key, 6)

    def lin(kw, kb, fan_in, fan_out):
        bound = 1.0 / jnp.sqrt(fan_in)
        w = jax.random.uniform(kw, (fan_in, fan_out), jnp.float32, -bound, bound)
        b = jax.random.uniform(kb, (1, fan_out), jnp.float32, -bound, bound)
        return w, b

    w1, b1 = lin(ks[0], ks[1], state_dim, hidden_dim)
    w2, b2 = lin(ks[2], ks[3], hidden_dim, hidden_dim)
    w3, b3 = lin(ks[4], ks[5], hidden_dim, action_dim)
    return {"w1": w1, "b1": b1, "w2": w2, "b2": b2, "w3": w3, "b3": b3}


def prepare_params(params):
    """One-time dtype/padding prep.

    Only the *hidden* dims are zero-padded to a lane-dense 128 multiple (exact
    through ReLU+linear).  The streamed dims (state_dim on the input side,
    action_dim on the output side) are left at their natural sizes.  All dims
    are recoverable from the array shapes (no Python ints in the jitted tree).
    """
    state_dim, hidden_dim = params["w1"].shape
    action_dim = params["w3"].shape[1]
    hp = _round_up(hidden_dim, _LANE)
    return {
        "w1": _pad2(params["w1"], state_dim, hp).astype(jnp.bfloat16),  # [S,  Hp]
        "b1": _pad2(params["b1"], 1, hp).astype(jnp.float32),           # [1,  Hp]
        "w2": _pad2(params["w2"], hp, hp).astype(jnp.bfloat16),         # [Hp, Hp]
        "b2": _pad2(params["b2"], 1, hp).astype(jnp.float32),           # [1,  Hp]
        "w3": _pad2(params["w3"], hp, action_dim).astype(jnp.bfloat16), # [Hp, A]
        "b3": params["b3"].astype(jnp.float32),                         # [1,  A]
    }


@functools.partial(jax.jit, static_argnames=("tm",))
def policy_discrete_forward(x, prepped, tm=None):
    """x: [B, state_dim] f32 -> logits [B, action_dim] f32 (fc3 output, no activation)."""
    B, state_dim = x.shape
    sd, hp = prepped["w1"].shape          # static (array shapes)
    action_dim = prepped["w3"].shape[1]   # static (array shapes)
    assert state_dim == sd, (state_dim, sd)

    if tm is None:
        # Large tiles to amortize the ~0.35us/grid-step overhead, but split into
        # >= 2 tiles whenever B allows so both v7x TensorCores get work
        # (harmless serial loop on single-TC v5e/v6e).
        tm = min(_TM_MAX, _round_up(pl.cdiv(B, 2), _SUBLANE))
    tm = max(_SUBLANE, _round_up(tm, _SUBLANE))
    tm = min(tm, _round_up(B, _SUBLANE))
    grid = (pl.cdiv(B, tm),)  # no batch round-up: partial last tile is masked

    return pl.pallas_call(
        _mlp_kernel,
        out_shape=jax.ShapeDtypeStruct((B, action_dim), jnp.float32),
        grid_spec=pltpu.PrefetchScalarGridSpec(
            num_scalar_prefetch=0,
            grid=grid,
            in_specs=[
                # streamed batch tile, natural (unpadded) state_dim = full last dim
                pl.BlockSpec((tm, state_dim), lambda i: (i, 0)),
                # weights / biases: constant block index -> VMEM-resident, DMA'd once
                pl.BlockSpec((state_dim, hp), lambda i: (0, 0)),
                pl.BlockSpec((1, hp), lambda i: (0, 0)),
                pl.BlockSpec((hp, hp), lambda i: (0, 0)),
                pl.BlockSpec((1, hp), lambda i: (0, 0)),
                pl.BlockSpec((hp, action_dim), lambda i: (0, 0)),
                pl.BlockSpec((1, action_dim), lambda i: (0, 0)),
            ],
            # output at natural action_dim width (full last dim) -> no post-slice
            out_specs=pl.BlockSpec((tm, action_dim), lambda i: (i, 0)),
        ),
        compiler_params=pltpu.CompilerParams(
            dimension_semantics=("parallel",),  # shard batch tiles across TCs (v7x)
        ),
    )(
        x,
        prepped["w1"], prepped["b1"],
        prepped["w2"], prepped["b2"],
        prepped["w3"], prepped["b3"],
    )


def _reference_forward_f32(x, params):
    h1 = jnp.maximum(x @ params["w1"] + params["b1"], 0.0)
    h2 = jnp.maximum(h1 @ params["w2"] + params["b2"], 0.0)
    return h2 @ params["w3"] + params["b3"]


def _reference_forward_bf16(x, params):
    """Same precision recipe as the kernel: bf16 operands, f32 accumulate/elementwise."""
    w1 = params["w1"].astype(jnp.bfloat16)
    w2 = params["w2"].astype(jnp.bfloat16)
    w3 = params["w3"].astype(jnp.bfloat16)
    h1 = jnp.dot(x.astype(jnp.bfloat16), w1, preferred_element_type=jnp.float32) + params["b1"]
    h1 = jnp.maximum(h1, 0.0).astype(jnp.bfloat16)
    h2 = jnp.dot(h1, w2, preferred_element_type=jnp.float32) + params["b2"]
    h2 = jnp.maximum(h2, 0.0).astype(jnp.bfloat16)
    return jnp.dot(h2, w3, preferred_element_type=jnp.float32) + params["b3"]


if __name__ == "__main__":
    # Small shapes consistent with the module: batch=8, state_dim=16, hidden=32, actions=8.
    B, state_dim, hidden_dim, action_dim = 8, 16, 32, 8

    key = jax.random.PRNGKey(0)
    k_x, k_p, k_big, k_odd = jax.random.split(key, 4)

    x = jax.random.normal(k_x, (B, state_dim), jnp.float32)
    params = init_params(k_p, state_dim, hidden_dim, action_dim)
    prepped = prepare_params(params)

    out = jax.block_until_ready(policy_discrete_forward(x, prepped))
    assert out.shape == (B, action_dim)

    # Numerics: close to the bf16-matched reference, loosely close to pure-f32 math.
    ref_bf16 = _reference_forward_bf16(x, params)
    ref_f32 = _reference_forward_f32(x, params)
    assert jnp.allclose(out, ref_bf16, atol=2e-3, rtol=2e-3)
    assert jnp.allclose(out, ref_f32, atol=5e-2, rtol=5e-2)

    # Exercise the multi-tile batch grid (two full 512-row tiles).
    x_big = jax.random.normal(k_big, (1024, state_dim), jnp.float32)
    out_big = jax.block_until_ready(policy_discrete_forward(x_big, prepped))
    assert out_big.shape == (1024, action_dim)
    assert jnp.allclose(out_big, _reference_forward_bf16(x_big, params), atol=2e-3, rtol=2e-3)

    # Exercise the cdiv grid with a partial last tile (B not a multiple of tm).
    x_odd = jax.random.normal(k_odd, (1000, state_dim), jnp.float32)
    out_odd = jax.block_until_ready(policy_discrete_forward(x_odd, prepped))
    assert out_odd.shape == (1000, action_dim)
    assert jnp.allclose(out_odd, _reference_forward_bf16(x_odd, params), atol=2e-3, rtol=2e-3)

    print("KERNEL_OK")
</pallas_src>

<mosaic_0001>
module attributes {stable_mosaic.version = 11 : i64} {
  func.func @_mlp_kernel(%arg0: i32, %arg1: memref<8x16xf32, #tpu.memory_space<vmem>>, %arg2: memref<16x128xbf16, #tpu.memory_space<vmem>>, %arg3: memref<1x128xf32, #tpu.memory_space<vmem>>, %arg4: memref<128x128xbf16, #tpu.memory_space<vmem>>, %arg5: memref<1x128xf32, #tpu.memory_space<vmem>>, %arg6: memref<128x8xbf16, #tpu.memory_space<vmem>>, %arg7: memref<1x8xf32, #tpu.memory_space<vmem>>, %arg8: memref<8x8xf32, #tpu.memory_space<vmem>>) attributes {dimension_semantics = [#tpu.dimension_semantics<parallel>], iteration_bounds = array<i64: 1>, scalar_prefetch = 0 : i64, scratch_operands = 0 : i64, tpu.core_type = #tpu.core_type<tc>, window_params = [{transform_indices = @transform_0, window_bounds = array<i64: 8, 16>}, {pipeline_mode = #tpu.pipeline_mode<synchronous>, transform_indices = @transform_1, window_bounds = array<i64: 16, 128>}, {pipeline_mode = #tpu.pipeline_mode<synchronous>, transform_indices = @transform_2, window_bounds = array<i64: 1, 128>}, {pipeline_mode = #tpu.pipeline_mode<synchronous>, transform_indices = @transform_3, window_bounds = array<i64: 128, 128>}, {pipeline_mode = #tpu.pipeline_mode<synchronous>, transform_indices = @transform_4, window_bounds = array<i64: 1, 128>}, {pipeline_mode = #tpu.pipeline_mode<synchronous>, transform_indices = @transform_5, window_bounds = array<i64: 128, 8>}, {pipeline_mode = #tpu.pipeline_mode<synchronous>, transform_indices = @transform_6, window_bounds = array<i64: 1, 8>}, {transform_indices = @transform_7, window_bounds = array<i64: 8, 8>}]} {
    %c0 = arith.constant 0 : index
    %c0_0 = arith.constant 0 : index
    %0 = vector.load %arg1[%c0, %c0_0] : memref<8x16xf32, #tpu.memory_space<vmem>>, vector<8x16xf32>
    %1 = arith.truncf %0 : vector<8x16xf32> to vector<8x16xbf16>
    %c0_1 = arith.constant 0 : index
    %c0_2 = arith.constant 0 : index
    %2 = vector.load %arg2[%c0_1, %c0_2] : memref<16x128xbf16, #tpu.memory_space<vmem>>, vector<16x128xbf16>
    %cst = arith.constant dense<0.000000e+00> : vector<8x128xf32>
    %3 = tpu.matmul %1, %2, %cst {dimension_numbers = #tpu.dot_dimension_numbers<[1], [0], [0], [1], [0, 0, 1, 1], [], []>} : vector<8x16xbf16>, vector<16x128xbf16>, vector<8x128xf32> -> vector<8x128xf32>
    %c0_3 = arith.constant 0 : index
    %c0_4 = arith.constant 0 : index
    %4 = vector.load %arg3[%c0_3, %c0_4] : memref<1x128xf32, #tpu.memory_space<vmem>>, vector<1x128xf32>
    %5 = vector.broadcast %4 : vector<1x128xf32> to vector<8x128xf32>
    %6 = arith.addf %3, %5 : vector<8x128xf32>
    %cst_5 = arith.constant 0.000000e+00 : f32
    %7 = vector.broadcast %cst_5 : f32 to vector<8x128xf32>
    %8 = arith.maximumf %6, %7 : vector<8x128xf32>
    %9 = arith.truncf %8 : vector<8x128xf32> to vector<8x128xbf16>
    %c0_6 = arith.constant 0 : index
    %c0_7 = arith.constant 0 : index
    %10 = vector.load %arg4[%c0_6, %c0_7] : memref<128x128xbf16, #tpu.memory_space<vmem>>, vector<128x128xbf16>
    %cst_8 = arith.constant dense<0.000000e+00> : vector<8x128xf32>
    %11 = tpu.matmul %9, %10, %cst_8 {dimension_numbers = #tpu.dot_dimension_numbers<[1], [0], [0], [1], [0, 0, 1, 1], [], []>} : vector<8x128xbf16>, vector<128x128xbf16>, vector<8x128xf32> -> vector<8x128xf32>
    %c0_9 = arith.constant 0 : index
    %c0_10 = arith.constant 0 : index
    %12 = vector.load %arg5[%c0_9, %c0_10] : memref<1x128xf32, #tpu.memory_space<vmem>>, vector<1x128xf32>
    %13 = vector.broadcast %12 : vector<1x128xf32> to vector<8x128xf32>
    %14 = arith.addf %11, %13 : vector<8x128xf32>
    %cst_11 = arith.constant 0.000000e+00 : f32
    %15 = vector.broadcast %cst_11 : f32 to vector<8x128xf32>
    %16 = arith.maximumf %14, %15 : vector<8x128xf32>
    %17 = arith.truncf %16 : vector<8x128xf32> to vector<8x128xbf16>
    %c0_12 = arith.constant 0 : index
    %c0_13 = arith.constant 0 : index
    %18 = vector.load %arg6[%c0_12, %c0_13] : memref<128x8xbf16, #tpu.memory_space<vmem>>, vector<128x8xbf16>
    %cst_14 = arith.constant dense<0.000000e+00> : vector<8x8xf32>
    %19 = tpu.matmul %17, %18, %cst_14 {dimension_numbers = #tpu.dot_dimension_numbers<[1], [0], [0], [1], [0, 0, 1, 1], [], []>} : vector<8x128xbf16>, vector<128x8xbf16>, vector<8x8xf32> -> vector<8x8xf32>
    %c0_15 = arith.constant 0 : index
    %c0_16 = arith.constant 0 : index
    %20 = vector.load %arg7[%c0_15, %c0_16] : memref<1x8xf32, #tpu.memory_space<vmem>>, vector<1x8xf32>
    %21 = vector.broadcast %20 : vector<1x8xf32> to vector<8x8xf32>
    %22 = arith.addf %19, %21 : vector<8x8xf32>
    %c0_17 = arith.constant 0 : index
    %c0_18 = arith.constant 0 : index
    %23 = vector.load %arg8[%c0_17, %c0_18] : memref<8x8xf32, #tpu.memory_space<vmem>>, vector<8x8xf32>
    tpu.vector_store %arg8[%c0_17, %c0_18], %22 {strides = array<i32>} : memref<8x8xf32, #tpu.memory_space<vmem>>, vector<8x8xf32>,
    return
  }
  func.func @transform_0(%arg0: i32) -> (i32, i32) {
    %c0_i32 = arith.constant 0 : i32
    %c0_i32_0 = arith.constant 0 : i32
    return %arg0, %c0_i32 : i32, i32
  }
  func.func @transform_1(%arg0: i32) -> (i32, i32) {
    %c0_i32 = arith.constant 0 : i32
    %c0_i32_0 = arith.constant 0 : i32
    %c0_i32_1 = arith.constant 0 : i32
    return %c0_i32, %c0_i32_0 : i32, i32
  }
  func.func @transform_2(%arg0: i32) -> (i32, i32) {
    %c0_i32 = arith.constant 0 : i32
    %c0_i32_0 = arith.constant 0 : i32
    %c0_i32_1 = arith.constant 0 : i32
    return %c0_i32, %c0_i32_0 : i32, i32
  }
  func.func @transform_3(%arg0: i32) -> (i32, i32) {
    %c0_i32 = arith.constant 0 : i32
    %c0_i32_0 = arith.constant 0 : i32
    %c0_i32_1 = arith.constant 0 : i32
    return %c0_i32, %c0_i32_0 : i32, i32
  }
  func.func @transform_4(%arg0: i32) -> (i32, i32) {
    %c0_i32 = arith.constant 0 : i32
    %c0_i32_0 = arith.constant 0 : i32
    %c0_i32_1 = arith.constant 0 : i32
    return %c0_i32, %c0_i32_0 : i32, i32
  }
  func.func @transform_5(%arg0: i32) -> (i32, i32) {
    %c0_i32 = arith.constant 0 : i32
    %c0_i32_0 = arith.constant 0 : i32
    %c0_i32_1 = arith.constant 0 : i32
    return %c0_i32, %c0_i32_0 : i32, i32
  }
  func.func @transform_6(%arg0: i32) -> (i32, i32) {
    %c0_i32 = arith.constant 0 : i32
    %c0_i32_0 = arith.constant 0 : i32
    %c0_i32_1 = arith.constant 0 : i32
    return %c0_i32, %c0_i32_0 : i32, i32
  }
  func.func @transform_7(%arg0: i32) -> (i32, i32) {
    %c0_i32 = arith.constant 0 : i32
    %c0_i32_0 = arith.constant 0 : i32
    return %arg0, %c0_i32 : i32, i32
  }
}

</mosaic_0001>

<bundles_post_ra>
// kernel: policy_discrete_forward.1
= control target key start
LH: loop header
LB: loop body
LE: loop exit
PB: predicated region body
PF: predicated region fallthrough
CT: control target
= control target key end

     0   :  { %v462_v1 = vmov 0.0   ;;  %vm45_vm0 = vcmask 130048   ;;  %vm463_vm1 = vmmov 0   ;;  %s600_s0 = inlined_call_operand.vmem [shape: f32[8,16], index: 0, kind: input, shape index: {}]   ;;  %s601_s1 = inlined_call_operand.vmem [shape: bf16[16,128], index: 1, kind: input, shape index: {}]   ;;  %s602_s2 = inlined_call_operand.vmem [shape: f32[1,128], index: 2, kind: input, shape index: {}]   ;;  %s603_s3 = inlined_call_operand.vmem [shape: bf16[128,128], index: 3, kind: input, shape index: {}]   ;;  %s604_s4 = inlined_call_operand.vmem [shape: f32[1,128], index: 4, kind: input, shape index: {}]   ;;  %s605_s5 = inlined_call_operand.vmem [shape: bf16[128,8], index: 5, kind: input, shape index: {}]   ;;  %s606_s6 = inlined_call_operand.vmem [shape: f32[1,8], index: 6, kind: input, shape index: {}]   ;;  %s607_s7 = inlined_call_operand.hbm [shape: f32[8,8], index: 7, kind: output, shape index: {}]  }
   0x1   :  { %v421_v0 = vld [vmem:[%s601_s1] sm:$0xff]   ;;  %372 = vmatprep.subr.bf16.mxu0 %v462_v1  ;;  %378 = vmatprep.subr.bf16.mxu1 %v462_v1  ;;  %v423_v5 = vld [vmem:[%s603_s3 + $0x8] sm:$0xff]   ;;  %v424_v6 = vld [vmem:[%s603_s3 + $0x10] sm:$0xff]  }
   0x2   :  { %v28_v2 = vld [vmem:[%s600_s0] sm:$0xff]  ;;  %373 = vmatpush3.bf16.msra.mxu0 %v421_v0  ;;  %374 = vmatprep.mubr.msk.bf16.mxu0 %vm463_vm1, %v462_v1  ;;  %v425_v7 = vld [vmem:[%s603_s3 + $0x18] sm:$0xff]  }
   0x3   :  { %v422_v3 = vld [vmem:[%s603_s3] sm:$0xff]   ;;  %v29_v4 = vpack.c.bf16 %v28_v2, %v28_v2  ;;  %394 = vmatprep.mubr.msk.bf16.mxu1 %vm463_vm1, %v462_v1  ;;  %398 = vmatprep.subr.bf16.mxu0 %v462_v1 }
   0x4   :  { %379 = vmatpush3.bf16.msra.mxu1 %v422_v3 }
   0x5   :  { %380 = vmatprep.subr.bf16.mxu1 %v462_v1  ;;  %375 = vmatmul.mubr.msk.bf16.vlgmr.msra.gmra.mrb[0].mxu0 %vm45_vm0, %v29_v4 }
   0x6   :  { %414 = vmatprep.mubr.msk.bf16.mxu0 %vm463_vm1, %v462_v1 }
   0x8   :  { %381 = vmatpush3.bf16.msra.mxu1 %v423_v5 }
   0x9   :  { %382 = vmatprep.subr.bf16.mxu1 %v462_v1 }
   0xc   :  { %383 = vmatpush3.bf16.msra.mxu1 %v424_v6 }
   0xd   :  { %384 = vmatprep.subr.bf16.mxu1 %v462_v1 }
   0xe   :  { %12 = vsyncpa [#allocation3], 0  ;;  %v426_v8 = vld [vmem:[%s603_s3 + $0x20] sm:$0xff]   ;;  %v427_v9 = vld [vmem:[%s603_s3 + $0x28] sm:$0xff]   ;;  %s464_s14 = smov [#allocation2]   ;;  %vm315_vm2 = vcmask 64512  }
   0xf   :  { %v428_v10 = vld [vmem:[%s603_s3 + $0x30] sm:$0xff]   ;;  %v429_v11 = vld [vmem:[%s603_s3 + $0x38] sm:$0xff]   ;;  %v430_v12 = vld [vmem:[%s605_s5] sm:$0xff]   ;;  %s323_s15 = sshll.u32 %s464_s14, 4  ;;  %s324_s15 = int_to_ptr.vmem [resolvable:$true] %s323_s15 }
  0x10   :  { %385 = vmatpush3.bf16.msra.mxu1 %v425_v7  ;;  %399 = vmatpush3.bf16.msra.mxu0 %v430_v12  ;;  %v431_v13 = vld [vmem:[%s605_s5 + $0x8] sm:$0xff]   ;;  %v432_v14 = vld [vmem:[%s605_s5 + $0x10] sm:$0xff]   ;;  %v433_v15 = vld [vmem:[%s605_s5 + $0x18] sm:$0xff]   ;;  %p443_p1 = scmp.lt.s32.totalorder %s324_s15, %s324_s15 }
  0x11   :  { %386 = vmatprep.subr.bf16.mxu1 %v462_v1  ;;  %400 = vmatprep.subr.bf16.mxu0 %v462_v1  ;;  %v434_v16 = vld [vmem:[%s605_s5 + $0x20] sm:$0xff]   ;;  %v435_v17 = vld [vmem:[%s605_s5 + $0x28] sm:$0xff]   ;;  %v436_v26 = vld [vmem:[%s605_s5 + $0x30] sm:$0xff]  }
  0x12   :  { %v331_v18 = vld [vmem:[%s602_s2] ss:$0 sm:$0xff]  ;;  %v437_v27 = vld [vmem:[%s605_s5 + $0x38] sm:$0xff]  }
  0x13   :  { %v334_v28 = vld [vmem:[%s604_s4] ss:$0 sm:$0xff]  ;;  %s438_s4 = scalar_lea.vmem %s324_s15, 128 }
  0x14   :  { %387 = vmatpush3.bf16.msra.mxu1 %v426_v8  ;;  %401 = vmatpush3.bf16.msra.mxu0 %v431_v13  ;;  %v343_v36 = vld [vmem:[%s606_s6] ss:$0 sm:$0xff]  ;;  %p439_p0 = scmp.ne.s32.totalorder %s324_s15, %s438_s4  ;;  %p444_p2 = scmp.lt.s32.totalorder %s438_s4, %s438_s4 }
  0x15   :  { %388 = vmatprep.subr.bf16.mxu1 %v462_v1  ;;  %402 = vmatprep.subr.bf16.mxu0 %v462_v1 }
  0x16   :  { %p445_p3 = por %p444_p2, %p443_p1 }
  0x18   :  { %389 = vmatpush3.bf16.msra.mxu1 %v427_v9  ;;  %403 = vmatpush3.bf16.msra.mxu0 %v432_v14  ;;  %p446_p4 = pnand %p445_p3, %p439_p0 }
  0x19   :  { %390 = vmatprep.subr.bf16.mxu1 %v462_v1  ;;  %404 = vmatprep.subr.bf16.mxu0 %v462_v1 }
  0x1c   :  { %391 = vmatpush3.bf16.msra.mxu1 %v428_v10  ;;  %405 = vmatpush3.bf16.msra.mxu0 %v433_v15 }
  0x1d   :  { %392 = vmatprep.subr.bf16.mxu1 %v462_v1  ;;  %406 = vmatprep.subr.bf16.mxu0 %v462_v1 }
  0x20   :  { %393 = vmatpush3.bf16.msra.mxu1 %v429_v11  ;;  %407 = vmatpush3.bf16.msra.mxu0 %v434_v16 }
  0x21   :  { %408 = vmatprep.subr.bf16.mxu0 %v462_v1 }
  0x24   :  { %409 = vmatpush3.bf16.msra.mxu0 %v435_v17 }
  0x25   :  { %410 = vmatprep.subr.bf16.mxu0 %v462_v1 }
  0x28   :  { %411 = vmatpush3.bf16.msra.mxu0 %v436_v26 }
  0x29   :  { %412 = vmatprep.subr.bf16.mxu0 %v462_v1 }
  0x2c   :  { %413 = vmatpush3.bf16.msra.mxu0 %v437_v27 }
  0xd8   :  { %v83_v19 = vpop.f32.mrb[0].mxu0 }
  0xd9   :  { %v84_v20 = vadd.f32 %v331_v18, %v83_v19  ;;  %v376_v21 = vpop.f32.mrb[1].mxu0 }
  0xda   :  { %v86_v22 = vpop.f32.mrb[2].mxu0 }
  0xdb   :  { %v89_v23 = vmax.f32 %v84_v20, 0.0  ;;  %v377_v24 = vpop.f32.mrb[3].mxu0 }
  0xdd   :  { %v90_v25 = vpack.c.bf16 %v89_v23, %v89_v23 }
  0xdf   :  { %395 = vmatmul.mubr.bf16.vlgmr.msra.gmra.mrb[0].mxu1 %v90_v25 }
 0x1b2   :  { %v196_v29 = vpop.f32.mrb[0].mxu1 }
 0x1b3   :  { %v197_v30 = vadd.f32 %v334_v28, %v196_v29  ;;  %v396_v31 = vpop.f32.mrb[1].mxu1 }
 0x1b4   :  { %v199_v32 = vpop.f32.mrb[2].mxu1 }
 0x1b5   :  { %v202_v33 = vmax.f32 %v197_v30, 0.0  ;;  %v397_v34 = vpop.f32.mrb[3].mxu1 }
 0x1b7   :  { %v203_v35 = vpack.c.bf16 %v202_v33, %v202_v33 }
 0x1b9   :  { %415 = vmatmul.mubr.bf16.vlgmr.msra.gmra.mrb[4].mxu0 %v203_v35 }
 0x28c   :  { %v309_v37 = vpop.f32.mrb[4].mxu0 }
 0x28d   :  { %v310_v38 = vadd.f32 %v343_v36, %v309_v37  ;;  %v416_v39 = vpop.f32.mrb[5].mxu0 }
 0x28e   :  { %v312_v40 = vpop.f32.mrb[6].mxu0 }
 0x28f   :  { %v417_v41 = vpop.f32.mrb[7].mxu0  ;;  %316 = vst.msk [vmem:[#allocation2] sm:$0xff] %vm315_vm2, %v310_v38 }
 0x290   :  { %449 = shalt.err (!%p446_p4)
}
 0x291   :  { %s450_s6 = scalar_lea.hbm %s607_s7, 128 }
 0x292   :  { %p451_p5 = scmp.ne.s32.totalorder %s607_s7, %s450_s6  ;;  %p454_p6 = scmp.lt.u32.totalorder %s450_s6, %s607_s7 }
 0x294   :  { %p456_p7 = pnand %p454_p6, %p451_p5 }
 0x296   :  { %459 = shalt.err (!%p456_p7)
}
 0x297   :  { %326 = dma.vmem_to_hbm [thread:$0]  %s324_s15, 128, %s607_s7, [#allocation3]  }
 0x298   :  { %460 = dma.done.wait [#allocation3], 128  }
 0x299   :  { %461 = vsyncadd [#allocation3], 4294967168 }
 0x29a   :  { %330 = vsyncpa [#allocation3], 1 }

</bundles_post_ra>
